<compile_context>
chip_gen: v7x
topology: tpu7x:2x2x1
jax: 0.10.0
libtpu: 0.0.40
codegen_flags: <defaults>
</compile_context>

<pallas_src>
import jax
import jax.numpy as jnp
from jax.experimental import pallas as pl
from jax.experimental.pallas import tpu as pltpu


def _round_up(n, m):
    return (n + m - 1) // m * m


def mlp_kernel(x_ref, w1_ref, b1_ref, w2_ref, b2_ref, w3_ref, b3_ref, o_ref):
    # Stage 1: Linear(F -> H1) + ReLU.  bf16 MXU operands, f32 accumulation,
    # f32 elementwise epilogue (v5e VPU has no bf16 path).
    x = x_ref[...].astype(jnp.bfloat16)
    h1 = jnp.dot(x, w1_ref[...], preferred_element_type=jnp.float32)
    h1 = jnp.maximum(h1 + b1_ref[...], 0.0)
    # TODO(synk): nn.Dropout skipped (inference / eval semantics => identity)

    # Stage 2: Linear(H1 -> H2) + ReLU.
    h2 = jnp.dot(h1.astype(jnp.bfloat16), w2_ref[...],
                 preferred_element_type=jnp.float32)
    h2 = jnp.maximum(h2 + b2_ref[...], 0.0)

    # Stage 3: Linear(H2 -> 1) as a VPU multiply + lane reduce (XLU) instead of
    # an N=1 MXU matmul (which would use 1/128 of the MXU lanes).
    # NOTE: output is (TILE_B, 1); masked vst is acceptable here since output
    # bytes are negligible compared to the x stream.
    o = jnp.sum(h2 * w3_ref[...], axis=-1, keepdims=True) + b3_ref[0, 0]
    o_ref[...] = o.astype(o_ref.dtype)


def neural_network_forward(x, params, tile_b=1024):
    """x: (B, F) float32.  params: dict of transposed weights / biases."""
    w1, b1, w2, b2, w3, b3 = (
        params["w1"], params["b1"],
        params["w2"], params["b2"],
        params["w3"], params["b3"],
    )
    B, F = x.shape
    H1 = w1.shape[1]
    H2 = w2.shape[1]

    # Batch tile: multiple of 8 sublanes; 1024 rows keeps the MXU well fed while
    # per-step VMEM stays around ~1 MiB (fits v7x's 64 MiB / default scoped limit).
    TB = min(tile_b, _round_up(B, 8))
    B_pad = _round_up(B, TB)
    if B_pad != B:
        x = jnp.pad(x, ((0, B_pad - B), (0, 0)))
    grid = (B_pad // TB,)

    const2d = lambda i: (0, 0)

    flops = 2 * B_pad * (F * H1 + H1 * H2 + H2)
    bytes_accessed = (
        x.nbytes + B_pad * 4  # x in, out
        + w1.nbytes + b1.nbytes + w2.nbytes + b2.nbytes + w3.nbytes + b3.nbytes
    )

    out = pl.pallas_call(
        mlp_kernel,
        out_shape=jax.ShapeDtypeStruct((B_pad, 1), jnp.float32),
        grid=grid,
        in_specs=[
            pl.BlockSpec((TB, F), lambda i: (i, 0)),   # x: tiled over batch
            pl.BlockSpec((F, H1), const2d),            # w1 (bf16), VMEM-resident
            pl.BlockSpec((1, H1), const2d),            # b1 (f32)
            pl.BlockSpec((H1, H2), const2d),           # w2 (bf16), VMEM-resident
            pl.BlockSpec((1, H2), const2d),            # b2 (f32)
            pl.BlockSpec((1, H2), const2d),            # w3 row (f32)
            pl.BlockSpec(memory_space=pltpu.MemorySpace.SMEM),  # b3 scalar
        ],
        out_specs=pl.BlockSpec((TB, 1), lambda i: (i, 0)),
        compiler_params=pltpu.CompilerParams(
            dimension_semantics=("parallel",)),        # shard batch across TCs (v7x)
        cost_estimate=pl.CostEstimate(
            flops=flops, transcendentals=0, bytes_accessed=bytes_accessed),
    )(x, w1, b1, w2, b2, w3, b3)

    return out[:B] if B_pad != B else out


def init_params(key, input_features, hidden_size=128, num_layers=2):
    """He (kaiming normal, fan_in, relu) init like the PyTorch module; zero biases.

    Weights kept in (in, out) layout (PyTorch stores (out, in)).  Hidden-layer
    weights are stored bf16 (MXU operands); the final layer is stored as a
    (1, hidden) f32 row for the VPU epilogue; biases are f32.
    """
    sizes = [input_features, hidden_size]
    h = hidden_size
    for _ in range(num_layers - 1):
        sizes.append(h // 2)
        h = h // 2
    sizes.append(1)  # final Linear(hidden, 1)

    params = {}
    keys = jax.random.split(key, len(sizes) - 1)
    n_layers = len(sizes) - 1
    for i, (fan_in, fan_out) in enumerate(zip(sizes[:-1], sizes[1:])):
        std = (2.0 / fan_in) ** 0.5  # kaiming_normal_, mode='fan_in', relu
        w = std * jax.random.normal(keys[i], (fan_in, fan_out), dtype=jnp.float32)
        if i == n_layers - 1:
            params[f"w{i+1}"] = w.T.astype(jnp.float32)        # (1, fan_in) row
            params[f"b{i+1}"] = jnp.zeros((1, 1), jnp.float32)
        else:
            params[f"w{i+1}"] = w.astype(jnp.bfloat16)         # bf16 MXU operand
            params[f"b{i+1}"] = jnp.zeros((1, fan_out), jnp.float32)
    return params


def ref_forward(x, p):
    """Pure-JAX reference with the same numerics (bf16 operands, f32 accum)."""
    h1 = jnp.maximum(
        jnp.dot(x.astype(jnp.bfloat16), p["w1"],
                preferred_element_type=jnp.float32) + p["b1"], 0.0)
    h2 = jnp.maximum(
        jnp.dot(h1.astype(jnp.bfloat16), p["w2"],
                preferred_element_type=jnp.float32) + p["b2"], 0.0)
    return jnp.sum(h2 * p["w3"], axis=-1, keepdims=True) + p["b3"]


if __name__ == "__main__":
    key = jax.random.PRNGKey(0)
    k_x, k_p = jax.random.split(key)

    batch = 64
    input_features = 32

    x = jax.random.normal(k_x, (batch, input_features), dtype=jnp.float32)
    params = init_params(k_p, input_features, hidden_size=128, num_layers=2)

    out = neural_network_forward(x, params, tile_b=1024)
    jax.block_until_ready(out)
    assert out.shape == (batch, 1), out.shape

    ref_out = ref_forward(x, params)
    assert jnp.allclose(out, ref_out, atol=1e-3, rtol=1e-3), \
        float(jnp.max(jnp.abs(out - ref_out)))

    print("KERNEL_OK")
</pallas_src>

<mosaic_0001>
module attributes {stable_mosaic.version = 11 : i64} {
  func.func @mlp_kernel(%arg0: i32, %arg1: memref<64x32xf32, #tpu.memory_space<vmem>>, %arg2: memref<32x128xbf16, #tpu.memory_space<vmem>>, %arg3: memref<1x128xf32, #tpu.memory_space<vmem>>, %arg4: memref<128x64xbf16, #tpu.memory_space<vmem>>, %arg5: memref<1x64xf32, #tpu.memory_space<vmem>>, %arg6: memref<1x64xf32, #tpu.memory_space<vmem>>, %arg7: memref<1x1xf32, #tpu.memory_space<smem>>, %arg8: memref<64x1xf32, #tpu.memory_space<vmem>>) attributes {dimension_semantics = [#tpu.dimension_semantics<parallel>], iteration_bounds = array<i64: 1>, scalar_prefetch = 0 : i64, scratch_operands = 0 : i64, tpu.core_type = #tpu.core_type<tc>, window_params = [{transform_indices = @transform_0, window_bounds = array<i64: 64, 32>}, {pipeline_mode = #tpu.pipeline_mode<synchronous>, transform_indices = @transform_1, window_bounds = array<i64: 32, 128>}, {pipeline_mode = #tpu.pipeline_mode<synchronous>, transform_indices = @transform_2, window_bounds = array<i64: 1, 128>}, {pipeline_mode = #tpu.pipeline_mode<synchronous>, transform_indices = @transform_3, window_bounds = array<i64: 128, 64>}, {pipeline_mode = #tpu.pipeline_mode<synchronous>, transform_indices = @transform_4, window_bounds = array<i64: 1, 64>}, {pipeline_mode = #tpu.pipeline_mode<synchronous>, transform_indices = @transform_5, window_bounds = array<i64: 1, 64>}, {transform_indices = @transform_6, window_bounds = array<i64: 1, 1>}, {transform_indices = @transform_7, window_bounds = array<i64: 64, 1>}]} {
    %c0 = arith.constant 0 : index
    %c0_0 = arith.constant 0 : index
    %0 = vector.load %arg1[%c0, %c0_0] : memref<64x32xf32, #tpu.memory_space<vmem>>, vector<64x32xf32>
    %1 = arith.truncf %0 : vector<64x32xf32> to vector<64x32xbf16>
    %c0_1 = arith.constant 0 : index
    %c0_2 = arith.constant 0 : index
    %2 = vector.load %arg2[%c0_1, %c0_2] : memref<32x128xbf16, #tpu.memory_space<vmem>>, vector<32x128xbf16>
    %cst = arith.constant dense<0.000000e+00> : vector<64x128xf32>
    %3 = tpu.matmul %1, %2, %cst {dimension_numbers = #tpu.dot_dimension_numbers<[1], [0], [0], [1], [0, 0, 1, 1], [], []>} : vector<64x32xbf16>, vector<32x128xbf16>, vector<64x128xf32> -> vector<64x128xf32>
    %c0_3 = arith.constant 0 : index
    %c0_4 = arith.constant 0 : index
    %4 = vector.load %arg3[%c0_3, %c0_4] : memref<1x128xf32, #tpu.memory_space<vmem>>, vector<1x128xf32>
    %5 = vector.broadcast %4 : vector<1x128xf32> to vector<64x128xf32>
    %6 = arith.addf %3, %5 : vector<64x128xf32>
    %cst_5 = arith.constant 0.000000e+00 : f32
    %7 = vector.broadcast %cst_5 : f32 to vector<64x128xf32>
    %8 = arith.maximumf %6, %7 : vector<64x128xf32>
    %9 = arith.truncf %8 : vector<64x128xf32> to vector<64x128xbf16>
    %c0_6 = arith.constant 0 : index
    %c0_7 = arith.constant 0 : index
    %10 = vector.load %arg4[%c0_6, %c0_7] : memref<128x64xbf16, #tpu.memory_space<vmem>>, vector<128x64xbf16>
    %cst_8 = arith.constant dense<0.000000e+00> : vector<64x64xf32>
    %11 = tpu.matmul %9, %10, %cst_8 {dimension_numbers = #tpu.dot_dimension_numbers<[1], [0], [0], [1], [0, 0, 1, 1], [], []>} : vector<64x128xbf16>, vector<128x64xbf16>, vector<64x64xf32> -> vector<64x64xf32>
    %c0_9 = arith.constant 0 : index
    %c0_10 = arith.constant 0 : index
    %12 = vector.load %arg5[%c0_9, %c0_10] : memref<1x64xf32, #tpu.memory_space<vmem>>, vector<1x64xf32>
    %13 = vector.broadcast %12 : vector<1x64xf32> to vector<64x64xf32>
    %14 = arith.addf %11, %13 : vector<64x64xf32>
    %cst_11 = arith.constant 0.000000e+00 : f32
    %15 = vector.broadcast %cst_11 : f32 to vector<64x64xf32>
    %16 = arith.maximumf %14, %15 : vector<64x64xf32>
    %c0_12 = arith.constant 0 : index
    %c0_13 = arith.constant 0 : index
    %17 = vector.load %arg6[%c0_12, %c0_13] : memref<1x64xf32, #tpu.memory_space<vmem>>, vector<1x64xf32>
    %18 = vector.broadcast %17 : vector<1x64xf32> to vector<64x64xf32>
    %19 = arith.mulf %16, %18 : vector<64x64xf32>
    %cst_14 = arith.constant dense<0.000000e+00> : vector<64xf32>
    %20 = vector.multi_reduction <add>, %19, %cst_14 [1] : vector<64x64xf32> to vector<64xf32>
    %21 = vector.shape_cast %20 : vector<64xf32> to vector<64x1xf32>
    %c0_15 = arith.constant 0 : index
    %c0_16 = arith.constant 0 : index
    %22 = memref.load %arg7[%c0_15, %c0_16] : memref<1x1xf32, #tpu.memory_space<smem>>
    %23 = vector.broadcast %22 : f32 to vector<64x1xf32>
    %24 = arith.addf %21, %23 : vector<64x1xf32>
    %c0_17 = arith.constant 0 : index
    %c0_18 = arith.constant 0 : index
    %25 = vector.load %arg8[%c0_17, %c0_18] : memref<64x1xf32, #tpu.memory_space<vmem>>, vector<64x1xf32>
    tpu.vector_store %arg8[%c0_17, %c0_18], %24 {strides = array<i32>} : memref<64x1xf32, #tpu.memory_space<vmem>>, vector<64x1xf32>,
    return
  }
  func.func @transform_0(%arg0: i32) -> (i32, i32) {
    %c0_i32 = arith.constant 0 : i32
    %c0_i32_0 = arith.constant 0 : i32
    return %arg0, %c0_i32 : i32, i32
  }
  func.func @transform_1(%arg0: i32) -> (i32, i32) {
    %c0_i32 = arith.constant 0 : i32
    %c0_i32_0 = arith.constant 0 : i32
    %c0_i32_1 = arith.constant 0 : i32
    return %c0_i32, %c0_i32_0 : i32, i32
  }
  func.func @transform_2(%arg0: i32) -> (i32, i32) {
    %c0_i32 = arith.constant 0 : i32
    %c0_i32_0 = arith.constant 0 : i32
    %c0_i32_1 = arith.constant 0 : i32
    return %c0_i32, %c0_i32_0 : i32, i32
  }
  func.func @transform_3(%arg0: i32) -> (i32, i32) {
    %c0_i32 = arith.constant 0 : i32
    %c0_i32_0 = arith.constant 0 : i32
    %c0_i32_1 = arith.constant 0 : i32
    return %c0_i32, %c0_i32_0 : i32, i32
  }
  func.func @transform_4(%arg0: i32) -> (i32, i32) {
    %c0_i32 = arith.constant 0 : i32
    %c0_i32_0 = arith.constant 0 : i32
    %c0_i32_1 = arith.constant 0 : i32
    return %c0_i32, %c0_i32_0 : i32, i32
  }
  func.func @transform_5(%arg0: i32) -> (i32, i32) {
    %c0_i32 = arith.constant 0 : i32
    %c0_i32_0 = arith.constant 0 : i32
    %c0_i32_1 = arith.constant 0 : i32
    return %c0_i32, %c0_i32_0 : i32, i32
  }
  func.func @transform_6(%arg0: i32) -> (i32, i32) {
    %c0_i32 = arith.constant 0 : i32
    %c0_i32_0 = arith.constant 0 : i32
    %c0_i32_1 = arith.constant 0 : i32
    return %c0_i32, %c0_i32_0 : i32, i32
  }
  func.func @transform_7(%arg0: i32) -> (i32, i32) {
    %c0_i32 = arith.constant 0 : i32
    %c0_i32_0 = arith.constant 0 : i32
    return %arg0, %c0_i32 : i32, i32
  }
}

</mosaic_0001>

<bundles_post_ra>
// kernel: tpu_custom_call.1
= control target key start
LH: loop header
LB: loop body
LE: loop exit
PB: predicated region body
PF: predicated region fallthrough
CT: control target
= control target key end

     0   :  { %vm63_vm0 = vcmask 261120   ;;  %vm312_vm1 = vcmask 523264   ;;  %vm347_vm2 = vcmask 7168   ;;  %s591_s1 = inlined_call_operand.vmem [shape: bf16[32,128], index: 1, kind: input, shape index: {}]   ;;  %s592_s0 = inlined_call_operand.vmem [shape: f32[64,32], index: 0, kind: input, shape index: {}]   ;;  %s593_s3 = inlined_call_operand.vmem [shape: bf16[128,64], index: 3, kind: input, shape index: {}]   ;;  %s594_s2 = inlined_call_operand.vmem [shape: f32[1,128], index: 2, kind: input, shape index: {}]   ;;  %s595_s4 = inlined_call_operand.vmem [shape: f32[1,64], index: 4, kind: input, shape index: {}]   ;;  %s596_s5 = inlined_call_operand.vmem [shape: f32[1,64], index: 5, kind: input, shape index: {}]   ;;  %s597_s6 = inlined_call_operand.<no memory space> [shape: f32[1,1], index: 6, kind: input, shape index: {}]   ;;  %s598_s7 = inlined_call_operand.vmem [shape: f32[64,1], index: 7, kind: output, shape index: {}]  }
   0x1   :  { %v431_v0 = vld [vmem:[%s591_s1] sm:$0xff]   ;;  %v432_v1 = vld [vmem:[%s591_s1 + $0x8] sm:$0xff]   ;;  %v30_v5 = vld [vmem:[%s592_s0 + $0x10] sm:$0xff] }
   0x2   :  { %395 = vmatprep.subr.bf16.mxu0 %v431_v0  ;;  %v28_v2 = vld [vmem:[%s592_s0] sm:$0xff]  ;;  %v29_v3 = vld [vmem:[%s592_s0 + $0x8] sm:$0xff]  ;;  %v31_v6 = vld [vmem:[%s592_s0 + $0x18] sm:$0xff] }
   0x3   :  { %396 = vmatpush3.bf16.msra.mxu0 %v431_v0  ;;  %v36_v4 = vpack.c.bf16 %v29_v3, %v28_v2  ;;  %v32_v7 = vld [vmem:[%s592_s0 + $0x20] sm:$0xff]  ;;  %v33_v8 = vld [vmem:[%s592_s0 + $0x28] sm:$0xff]  ;;  %v37_v10 = vpack.c.bf16 %v31_v6, %v30_v5  ;;  %v34_v13 = vld [vmem:[%s592_s0 + $0x30] sm:$0xff] }
   0x4   :  { %397 = vmatprep.subr.bf16.mxu0 %v432_v1  ;;  %v433_v9 = vld [vmem:[%s593_s3] sm:$0xff]   ;;  %v434_v11 = vld [vmem:[%s593_s3 + $0x8] sm:$0xff]   ;;  %v38_v12 = vpack.c.bf16 %v33_v8, %v32_v7  ;;  %v435_v14 = vld [vmem:[%s593_s3 + $0x10] sm:$0xff]  }
   0x5   :  { %399 = vmatprep.mubr.msk.bf16.mxu0 %vm63_vm0, %v36_v4  ;;  %407 = vmatprep.subr.bf16.mxu1 %v433_v9  ;;  %v35_v15 = vld [vmem:[%s592_s0 + $0x38] sm:$0xff]  ;;  %v437_v18 = vld [vmem:[%s593_s3 + $0x20] sm:$0xff]   ;;  %v438_v19 = vld [vmem:[%s593_s3 + $0x28] sm:$0xff]  }
   0x6   :  { %408 = vmatpush3.bf16.msra.mxu1 %v433_v9  ;;  %v436_v16 = vld [vmem:[%s593_s3 + $0x18] sm:$0xff]   ;;  %v39_v17 = vpack.c.bf16 %v35_v15, %v34_v13  ;;  %v439_v20 = vld [vmem:[%s593_s3 + $0x30] sm:$0xff]   ;;  %v360_v22 = vld [vmem:[%s594_s2] ss:$0 sm:$0xff] }
   0x7   :  { %398 = vmatpush3.bf16.msra.mxu0 %v432_v1  ;;  %409 = vmatprep.subr.bf16.mxu1 %v434_v11  ;;  %v440_v21 = vld [vmem:[%s593_s3 + $0x38] sm:$0xff]   ;;  %v367_v51 = vld [vmem:[%s595_s4] ss:$0 sm:$0xff] }
   0x8   :  { %v376_v57 = vld [vmem:[%s596_s5] ss:$0 sm:$0xff] }
   0xa   :  { %400 = vmatmul.mubr.msk.bf16.vlgmr.msra.gmra.mrb[0].mxu0 %vm63_vm0, %v37_v10  ;;  %410 = vmatpush3.bf16.msra.mxu1 %v434_v11 }
   0xb   :  { %403 = vmatprep.mubr.msk.bf16.mxu0 %vm63_vm0, %v38_v12  ;;  %411 = vmatprep.subr.bf16.mxu1 %v435_v14 }
   0xe   :  { %412 = vmatpush3.bf16.msra.mxu1 %v435_v14 }
   0xf   :  { %413 = vmatprep.subr.bf16.mxu1 %v436_v16 }
  0x12   :  { %404 = vmatmul.mubr.msk.bf16.gmra.mrb[4].mxu0 %vm63_vm0, %v39_v17  ;;  %414 = vmatpush3.bf16.msra.mxu1 %v436_v16 }
  0x13   :  { %415 = vmatprep.subr.bf16.mxu1 %v437_v18 }
  0x16   :  { %416 = vmatpush3.bf16.msra.mxu1 %v437_v18 }
  0x17   :  { %417 = vmatprep.subr.bf16.mxu1 %v438_v19 }
  0x1a   :  { %418 = vmatpush3.bf16.msra.mxu1 %v438_v19 }
  0x1b   :  { %419 = vmatprep.subr.bf16.mxu1 %v439_v20 }
  0x1e   :  { %420 = vmatpush3.bf16.msra.mxu1 %v439_v20 }
  0x1f   :  { %421 = vmatprep.subr.bf16.mxu1 %v440_v21 }
  0x22   :  { %422 = vmatpush3.bf16.msra.mxu1 %v440_v21 }
  0xdd   :  { %v401_v23 = vpop.f32.mrb[0].mxu0 }
  0xde   :  { %v119_v24 = vadd.f32 %v401_v23, %v360_v22  ;;  %v110_v25 = vpop.f32.mrb[1].mxu0 }
  0xdf   :  { %v111_v26 = vadd.f32 %v360_v22, %v110_v25  ;;  %v402_v27 = vpop.f32.mrb[2].mxu0 }
  0xe0   :  { %v122_v28 = vadd.f32 %v402_v27, %v360_v22  ;;  %v113_v29 = vpop.f32.mrb[3].mxu0  ;;  %v143_v31 = vmax.f32 %v119_v24, 0.0 }
  0xe1   :  { %v114_v30 = vadd.f32 %v360_v22, %v113_v29  ;;  %v141_v33 = vmax.f32 %v111_v26, 0.0  ;;  %v338_v29 = vstv %s597_s6 }
  0xe2   :  { %v144_v32 = vmax.f32 %v122_v28, 0.0 }
  0xe3   :  { %v142_v34 = vmax.f32 %v114_v30, 0.0 }
  0xe4   :  { %v150_v35 = vpack.c.bf16 %v144_v32, %v143_v31 }
  0xe5   :  { %v405_v36 = vpop.f32.mrb[4].mxu0  ;;  %v149_v37 = vpack.c.bf16 %v142_v34, %v141_v33 }
  0xe6   :  { %v135_v38 = vadd.f32 %v405_v36, %v360_v22  ;;  %v126_v39 = vpop.f32.mrb[5].mxu0 }
  0xe7   :  { %v127_v40 = vadd.f32 %v360_v22, %v126_v39  ;;  %v406_v41 = vpop.f32.mrb[6].mxu0  ;;  %423 = vmatprep.mubr.bf16.mxu1 %v149_v37 }
  0xe8   :  { %v138_v42 = vadd.f32 %v406_v41, %v360_v22  ;;  %v129_v43 = vpop.f32.mrb[7].mxu0  ;;  %424 = vmatmul.mubr.bf16.vlgmr.msra.gmra.mrb[0].mxu1 %v150_v35  ;;  %v147_v45 = vmax.f32 %v135_v38, 0.0 }
  0xe9   :  { %v130_v44 = vadd.f32 %v360_v22, %v129_v43  ;;  %v145_v47 = vmax.f32 %v127_v40, 0.0 }
  0xea   :  { %v148_v46 = vmax.f32 %v138_v42, 0.0 }
  0xeb   :  { %v146_v48 = vmax.f32 %v130_v44, 0.0 }
  0xec   :  { %v152_v49 = vpack.c.bf16 %v148_v46, %v147_v45 }
  0xed   :  { %v151_v50 = vpack.c.bf16 %v146_v48, %v145_v47 }
  0xef   :  { %427 = vmatprep.mubr.bf16.mxu1 %v151_v50 }
  0xf0   :  { %428 = vmatmul.mubr.bf16.gmra.mrb[4].mxu1 %v152_v49 }
 0x1bb   :  { %v425_v52 = vpop.f32.mrb[0].mxu1 }
 0x1bc   :  { %v267_v53 = vadd.f32 %v425_v52, %v367_v51  ;;  %v258_v54 = vpop.f32.mrb[1].mxu1 }
 0x1bd   :  { %v259_v55 = vadd.f32 %v367_v51, %v258_v54  ;;  %v426_v56 = vpop.f32.mrb[2].mxu1 }
 0x1be   :  { %v291_v58 = vmax.f32 %v267_v53, 0.0  ;;  %v270_v59 = vadd.f32 %v426_v56, %v367_v51  ;;  %v261_v60 = vpop.f32.mrb[3].mxu1 }
 0x1bf   :  { %v289_v61 = vmax.f32 %v259_v55, 0.0  ;;  %v262_v62 = vadd.f32 %v367_v51, %v261_v60 }
 0x1c0   :  { %v292_v63 = vmax.f32 %v270_v59, 0.0  ;;  %v306_v0 = vmul.f32 %v376_v57, %v291_v58 }
 0x1c1   :  { %v290_v1 = vmax.f32 %v262_v62, 0.0  ;;  %v304_v2 = vmul.f32 %v376_v57, %v289_v61 }
 0x1c2   :  { %v319_v3 = vsel %vm312_vm1, %v306_v0, 0.0  ;;  %v307_v4 = vmul.f32 %v376_v57, %v292_v63 }
 0x1c3   :  { %320 = vadd.xlane.f32.xlu1 %v319_v3  ;;  %v429_v5 = vpop.f32.mrb[4].mxu1  ;;  %v313_v6 = vsel %vm312_vm1, %v304_v2, 0.0  ;;  %v305_v7 = vmul.f32 %v376_v57, %v290_v1 }
 0x1c4   :  { %v283_v8 = vadd.f32 %v429_v5, %v367_v51  ;;  %v274_v9 = vpop.f32.mrb[5].mxu1  ;;  %314 = vadd.xlane.f32.xlu0 %v313_v6  ;;  %v322_v14 = vsel %vm312_vm1, %v307_v4, 0.0 }
 0x1c5   :  { %v275_v10 = vadd.f32 %v367_v51, %v274_v9  ;;  %v430_v11 = vpop.f32.mrb[6].mxu1  ;;  %v316_v18 = vsel %vm312_vm1, %v305_v7, 0.0 }
 0x1c6   :  { %v286_v12 = vadd.f32 %v430_v11, %v367_v51  ;;  %v277_v13 = vpop.f32.mrb[7].mxu1  ;;  %v295_v15 = vmax.f32 %v283_v8, 0.0 }
 0x1c7   :  { %v293_v16 = vmax.f32 %v275_v10, 0.0  ;;  %v278_v17 = vadd.f32 %v367_v51, %v277_v13  ;;  %323 = vadd.xlane.f32.xlu1 %v322_v14 }
 0x1c8   :  { %317 = vadd.xlane.f32.xlu0 %v316_v18  ;;  %v296_v19 = vmax.f32 %v286_v12, 0.0  ;;  %v310_v24 = vmul.f32 %v376_v57, %v295_v15 }
 0x1c9   :  { %v294_v20 = vmax.f32 %v278_v17, 0.0  ;;  %v308_v21 = vmul.f32 %v376_v57, %v293_v16 }
 0x1ca   :  { %v311_v26 = vmul.f32 %v376_v57, %v296_v19  ;;  %v331_v27 = vsel %vm312_vm1, %v310_v24, 0.0 }
 0x1cb   :  { %v325_v22 = vsel %vm312_vm1, %v308_v21, 0.0  ;;  %v309_v23 = vmul.f32 %v376_v57, %v294_v20 }
 0x1cc   :  { %326 = vadd.xlane.f32.xlu0 %v325_v22  ;;  %v334_v28 = vsel %vm312_vm1, %v311_v26, 0.0 }
 0x1cd   :  { %v328_v25 = vsel %vm312_vm1, %v309_v23, 0.0 }
 0x1ce   :  { %329 = vadd.xlane.f32.xlu1 %v328_v25 }
 0x1d0   :  { %332 = vadd.xlane.f32.xlu0 %v331_v27 }
 0x1d2   :  { %335 = vadd.xlane.f32.xlu1 %v334_v28 }
 0x250   :  { %v321_v30 = vpop.xlane.xlu1 %320 }
 0x251   :  { %v341_v31 = vadd.f32 %v338_v29, %v321_v30  ;;  %v315_v32 = vpop.xlane.xlu0 %314 }
 0x252   :  { %v339_v33 = vadd.f32 %v338_v29, %v315_v32 }
 0x253   :  { %350 = vst.msk [vmem:[%s598_s7 + $0x10] sm:$0xff] %vm347_vm2, %v341_v31 }
 0x254   :  { %348 = vst.msk [vmem:[%s598_s7] sm:$0xff] %vm347_vm2, %v339_v33  ;;  %v324_v34 = vpop.xlane.xlu1 %323 }
 0x255   :  { %v342_v35 = vadd.f32 %v338_v29, %v324_v34  ;;  %v318_v36 = vpop.xlane.xlu0 %317 }
 0x256   :  { %v340_v37 = vadd.f32 %v338_v29, %v318_v36 }
 0x257   :  { %351 = vst.msk [vmem:[%s598_s7 + $0x18] sm:$0xff] %vm347_vm2, %v342_v35 }
 0x258   :  { %349 = vst.msk [vmem:[%s598_s7 + $0x8] sm:$0xff] %vm347_vm2, %v340_v37 }
 0x259   :  { %v327_v38 = vpop.xlane.xlu0 %326 }
 0x25a   :  { %v343_v39 = vadd.f32 %v338_v29, %v327_v38 }
 0x25b   :  { %v330_v40 = vpop.xlane.xlu1 %329 }
 0x25c   :  { %352 = vst.msk [vmem:[%s598_s7 + $0x20] sm:$0xff] %vm347_vm2, %v343_v39  ;;  %v344_v41 = vadd.f32 %v338_v29, %v330_v40 }
 0x25d   :  { %v333_v42 = vpop.xlane.xlu0 %332 }
 0x25e   :  { %353 = vst.msk [vmem:[%s598_s7 + $0x28] sm:$0xff] %vm347_vm2, %v344_v41  ;;  %v345_v43 = vadd.f32 %v338_v29, %v333_v42 }
 0x25f   :  { %v336_v44 = vpop.xlane.xlu1 %335 }
 0x260   :  { %354 = vst.msk [vmem:[%s598_s7 + $0x30] sm:$0xff] %vm347_vm2, %v345_v43  ;;  %v346_v45 = vadd.f32 %v338_v29, %v336_v44 }
 0x262   :  { %355 = vst.msk [vmem:[%s598_s7 + $0x38] sm:$0xff] %vm347_vm2, %v346_v45 }

</bundles_post_ra>
